<compile_context>
chip_gen: v7x
topology: tpu7x:2x2x1
jax: 0.10.0
libtpu: 0.0.40
codegen_flags: <defaults>
</compile_context>

<pallas_src>
import functools

import jax
import jax.numpy as jnp
from jax.experimental import pallas as pl
from jax.experimental.pallas import tpu as pltpu

LN_EPS = 1e-5  # torch.nn.LayerNorm default eps


@functools.lru_cache(maxsize=None)
def _vmem_limit_bytes():
    # ~75% of physical VMEM, capped at 100 MiB:
    #   v5e/v6e (128 MiB) -> 96 MiB, v7x (64 MiB) -> 48 MiB.
    try:
        cap = int(pltpu.get_tpu_info().vmem_capacity_bytes)
    except Exception:
        cap = 64 * 1024 * 1024
    return int(min(cap * 3 // 4, 100 * 1024 * 1024))


def _cparams(*sem):
    return pltpu.CompilerParams(dimension_semantics=sem,
                                vmem_limit_bytes=_vmem_limit_bytes())


def _pick_tile(m, target=512):
    """Largest row tile <= target that divides m (full extent if m <= target)."""
    if m <= target:
        return m
    for t in range(target, 0, -1):
        if m % t == 0 and t % 8 == 0:
            return t
    return m


def _round_up(x, mult):
    return -(-x // mult) * mult


# ----------------------------------------------------------------------------
# In-kernel math helpers (guaranteed-to-lower primitives only)
# ----------------------------------------------------------------------------
def _layernorm(x, g, b):
    mu = jnp.mean(x, axis=-1, keepdims=True)
    var = jnp.mean(jnp.square(x - mu), axis=-1, keepdims=True)
    return (x - mu) * jax.lax.rsqrt(var + LN_EPS) * g + b


def _erf_f32(x):
    # Abramowitz & Stegun 7.1.26, |err| <= 1.5e-7 (close to f32-exact).
    a1, a2, a3, a4, a5 = 0.254829592, -0.284496736, 1.421413741, -1.453152027, 1.061405429
    p = 0.3275911
    sgn = jnp.where(x < 0.0, -1.0, 1.0)
    ax = jnp.abs(x)
    t = 1.0 / (1.0 + p * ax)
    poly = ((((a5 * t + a4) * t + a3) * t + a2) * t + a1) * t
    return sgn * (1.0 - poly * jnp.exp(-ax * ax))


def _gelu_exact(x):
    # torch.nn.GELU default (erf form)
    return 0.5 * x * (1.0 + _erf_f32(x * 0.7071067811865476))


# ----------------------------------------------------------------------------
# Kernel 1: row-tiled linear (used for proj_dec).  bf16 weight, f32 accum.
# ----------------------------------------------------------------------------
def _linear_kernel(x_ref, w_ref, b_ref, o_ref):
    y = jnp.dot(x_ref[...].astype(jnp.bfloat16), w_ref[...],
                preferred_element_type=jnp.float32) + b_ref[...]
    o_ref[...] = y.astype(o_ref.dtype)


def linear(x, w, b, *, row_tile=512):
    M, K = x.shape
    N = w.shape[1]
    tm = _pick_tile(M, row_tile)
    return pl.pallas_call(
        _linear_kernel,
        out_shape=jax.ShapeDtypeStruct((M, N), jnp.float32),
        grid=(M // tm,),
        in_specs=[
            pl.BlockSpec((tm, K), lambda i: (i, 0)),
            pl.BlockSpec((K, N), lambda i: (0, 0)),   # weights resident
            pl.BlockSpec((1, N), lambda i: (0, 0)),
        ],
        out_specs=pl.BlockSpec((tm, N), lambda i: (i, 0)),
        compiler_params=_cparams("parallel"),
    )(x, w, b)


# ----------------------------------------------------------------------------
# Kernel 2: fused LN1 -> QKV -> attention -> output projection -> residual.
#   Per-batch grid step; heads split with static in-VMEM slices (lane-dense,
#   no q/k/v HBM round-trip); per-head score loop bounds VMEM at O(S*S).
# ----------------------------------------------------------------------------
def _block_attn_kernel(y_ref, g_ref, b_ref, wqkv_ref, bqkv_ref, wp_ref, bp_ref,
                       o_ref, *, n_heads, head_dim, scale):
    x = y_ref[0]                                           # (S, D) f32 residual
    h = _layernorm(x, g_ref[...], b_ref[...])
    qkv = jnp.dot(h.astype(jnp.bfloat16), wqkv_ref[...],
                  preferred_element_type=jnp.float32) + bqkv_ref[...]  # (S, 3D)
    D = n_heads * head_dim
    heads = []
    for hh in range(n_heads):                              # static head split
        lo = hh * head_dim
        q = qkv[:, lo:lo + head_dim].astype(jnp.bfloat16)
        k = qkv[:, D + lo:D + lo + head_dim].astype(jnp.bfloat16)
        v = qkv[:, 2 * D + lo:2 * D + lo + head_dim].astype(jnp.bfloat16)
        s = jax.lax.dot_general(q, k, (((1,), (1,)), ((), ())),
                                preferred_element_type=jnp.float32) * scale
        s = s - jnp.max(s, axis=-1, keepdims=True)
        p = jnp.exp(s)
        p = p * pl.reciprocal(jnp.sum(p, axis=-1, keepdims=True), approx=True)
        heads.append(jnp.dot(p.astype(jnp.bfloat16), v,
                             preferred_element_type=jnp.float32)
                     .astype(jnp.bfloat16))
    attn_out = jnp.concatenate(heads, axis=-1)             # (S, D) bf16, lane-dense
    total = x + bp_ref[...] + jnp.dot(attn_out, wp_ref[...],
                                      preferred_element_type=jnp.float32)
    o_ref[0] = total.astype(o_ref.dtype)


def attn_block(y, g, b, qkv_w, qkv_b, proj_w, proj_b, *, n_heads):
    bsz, S, D = y.shape
    hd = D // n_heads
    return pl.pallas_call(
        functools.partial(_block_attn_kernel, n_heads=n_heads, head_dim=hd,
                          scale=hd ** (-0.5)),
        out_shape=jax.ShapeDtypeStruct((bsz, S, D), jnp.float32),
        grid=(bsz,),
        in_specs=[
            pl.BlockSpec((1, S, D), lambda i: (i, 0, 0)),
            pl.BlockSpec((1, D), lambda i: (0, 0)),
            pl.BlockSpec((1, D), lambda i: (0, 0)),
            pl.BlockSpec((D, 3 * D), lambda i: (0, 0)),
            pl.BlockSpec((1, 3 * D), lambda i: (0, 0)),
            pl.BlockSpec((D, D), lambda i: (0, 0)),
            pl.BlockSpec((1, D), lambda i: (0, 0)),
        ],
        out_specs=pl.BlockSpec((1, S, D), lambda i: (i, 0, 0)),
        compiler_params=_cparams("parallel"),
    )(y, g, b, qkv_w, qkv_b, proj_w, proj_b)


# ----------------------------------------------------------------------------
# Kernel 3: fused MLP  (LN2 -> fc1 -> GELU -> fc2 -> +residual), row-tiled.
# ----------------------------------------------------------------------------
def _mlp_kernel(y_ref, g_ref, b_ref, w1_ref, b1_ref, w2_ref, b2_ref, o_ref):
    x = y_ref[...]                                         # (TM, D) f32
    h = _layernorm(x, g_ref[...], b_ref[...])
    f = jnp.dot(h.astype(jnp.bfloat16), w1_ref[...],
                preferred_element_type=jnp.float32) + b1_ref[...]
    f = _gelu_exact(f)
    f = jnp.dot(f.astype(jnp.bfloat16), w2_ref[...],
                preferred_element_type=jnp.float32) + b2_ref[...]
    o_ref[...] = (x + f).astype(o_ref.dtype)


def mlp_residual(y2d, g, b, w1, b1, w2, b2, *, row_tile=512):
    M, D = y2d.shape
    dff = w1.shape[1]
    tm = _pick_tile(M, row_tile)
    return pl.pallas_call(
        _mlp_kernel,
        out_shape=jax.ShapeDtypeStruct((M, D), jnp.float32),
        grid=(M // tm,),
        in_specs=[
            pl.BlockSpec((tm, D), lambda i: (i, 0)),
            pl.BlockSpec((1, D), lambda i: (0, 0)),
            pl.BlockSpec((1, D), lambda i: (0, 0)),
            pl.BlockSpec((D, dff), lambda i: (0, 0)),      # weights resident (bf16)
            pl.BlockSpec((1, dff), lambda i: (0, 0)),
            pl.BlockSpec((dff, D), lambda i: (0, 0)),
            pl.BlockSpec((1, D), lambda i: (0, 0)),
        ],
        out_specs=pl.BlockSpec((tm, D), lambda i: (i, 0)),
        compiler_params=_cparams("parallel"),
    )(y2d, g, b, w1, b1, w2, b2)


# ----------------------------------------------------------------------------
# Kernel 4: mask head with decoder LayerNorm fused in.
#   * class-token branch computed once per batch into VMEM scratch (pl.when).
#   * n_cls lane-padded to a multiple of 128; mask_norm mean/var masked to the
#     real n_cls columns (exact semantics); padding sliced off in the wrapper.
# ----------------------------------------------------------------------------
def _mask_head_kernel(p_ref, c_ref, dg_ref, db_ref, pp_ref, pc_ref,
                      mg_ref, mb_ref, o_ref, cls_scratch, *, n_cls, n_cls_pad):
    dg = dg_ref[...]
    db = db_ref[...]

    @pl.when(pl.program_id(1) == 0)
    def _():
        cls_f = _layernorm(c_ref[0].astype(jnp.float32), dg, db)    # (Ncp, D)
        cls_f = jnp.dot(cls_f.astype(jnp.bfloat16), pc_ref[...],
                        preferred_element_type=jnp.float32)
        cls_f = cls_f * jax.lax.rsqrt(jnp.sum(cls_f * cls_f, -1, keepdims=True))
        row = jax.lax.broadcasted_iota(jnp.int32, (n_cls_pad, 1), 0)
        cls_f = jnp.where(row < n_cls, cls_f, 0.0)                  # zero pad rows
        cls_scratch[...] = cls_f.astype(cls_scratch.dtype)

    patches = _layernorm(p_ref[0].astype(jnp.float32), dg, db)      # (TP, D)
    patches = jnp.dot(patches.astype(jnp.bfloat16), pp_ref[...],
                      preferred_element_type=jnp.float32)
    patches = patches * jax.lax.rsqrt(jnp.sum(patches * patches, -1, keepdims=True))
    # patches @ cls^T without explicit transpose (contract last dims)
    m = jax.lax.dot_general(patches.astype(jnp.bfloat16), cls_scratch[...],
                            (((1,), (1,)), ((), ())),
                            preferred_element_type=jnp.float32)      # (TP, Ncp)
    # mask_norm: LayerNorm over the REAL n_cls columns only.
    col = jax.lax.broadcasted_iota(jnp.int32, m.shape, 1)
    valid = col < n_cls
    mean = jnp.sum(jnp.where(valid, m, 0.0), -1, keepdims=True) / n_cls
    diff = m - mean
    var = jnp.sum(jnp.where(valid, diff * diff, 0.0), -1, keepdims=True) / n_cls
    out = diff * jax.lax.rsqrt(var + LN_EPS) * mg_ref[...] + mb_ref[...]
    o_ref[0] = out.astype(o_ref.dtype)


def mask_head(patches, cls_tok, dec_g, dec_b, proj_patch, proj_classes,
              mask_g, mask_b, *, row_tile=512):
    bsz, Np, D = patches.shape
    n_cls = cls_tok.shape[1]
    n_cls_pad = _round_up(n_cls, 128)                      # lane-dense output
    tp = _pick_tile(Np, row_tile)

    cls_pad = jnp.pad(cls_tok, ((0, 0), (0, n_cls_pad - n_cls), (0, 0)))
    mg_pad = jnp.pad(mask_g, ((0, 0), (0, n_cls_pad - n_cls)), constant_values=1.0)
    mb_pad = jnp.pad(mask_b, ((0, 0), (0, n_cls_pad - n_cls)))

    masks = pl.pallas_call(
        functools.partial(_mask_head_kernel, n_cls=n_cls, n_cls_pad=n_cls_pad),
        out_shape=jax.ShapeDtypeStruct((bsz, Np, n_cls_pad), jnp.float32),
        grid=(bsz, Np // tp),
        in_specs=[
            pl.BlockSpec((1, tp, D), lambda i, j: (i, j, 0)),
            pl.BlockSpec((1, n_cls_pad, D), lambda i, j: (i, 0, 0)),
            pl.BlockSpec((1, D), lambda i, j: (0, 0)),
            pl.BlockSpec((1, D), lambda i, j: (0, 0)),
            pl.BlockSpec((D, D), lambda i, j: (0, 0)),
            pl.BlockSpec((D, D), lambda i, j: (0, 0)),
            pl.BlockSpec((1, n_cls_pad), lambda i, j: (0, 0)),
            pl.BlockSpec((1, n_cls_pad), lambda i, j: (0, 0)),
        ],
        out_specs=pl.BlockSpec((1, tp, n_cls_pad), lambda i, j: (i, j, 0)),
        scratch_shapes=[pltpu.VMEM((n_cls_pad, D), jnp.bfloat16)],
        # j axis must stay in-order: cls scratch is written at j == 0.
        compiler_params=_cparams("parallel", "arbitrary"),
    )(patches, cls_pad, dec_g, dec_b, proj_patch, proj_classes, mg_pad, mb_pad)
    return masks[:, :, :n_cls]


# ----------------------------------------------------------------------------
# Model (parameters + forward)
# ----------------------------------------------------------------------------
def init_params(key, n_cls, d_encoder, n_layers, n_heads, d_model, d_ff):
    keys = jax.random.split(key, 8 + 8 * n_layers)
    it = iter(keys)

    def nrm(k, shape, std=0.02, dtype=jnp.bfloat16):
        return (std * jax.random.normal(k, shape, jnp.float32)).astype(dtype)

    scale = d_model ** (-0.5)
    params = {
        "n_cls": n_cls,
        "n_heads": n_heads,
        "proj_dec_w": nrm(next(it), (d_encoder, d_model)),
        "proj_dec_b": jnp.zeros((1, d_model), jnp.float32),
        "cls_emb": nrm(next(it), (1, n_cls, d_model), dtype=jnp.float32),
        "proj_patch": (scale * jax.random.normal(next(it), (d_model, d_model),
                                                 jnp.float32)).astype(jnp.bfloat16),
        "proj_classes": (scale * jax.random.normal(next(it), (d_model, d_model),
                                                   jnp.float32)).astype(jnp.bfloat16),
        "dec_norm_g": jnp.ones((1, d_model), jnp.float32),
        "dec_norm_b": jnp.zeros((1, d_model), jnp.float32),
        "mask_norm_g": jnp.ones((1, n_cls), jnp.float32),
        "mask_norm_b": jnp.zeros((1, n_cls), jnp.float32),
        "blocks": [],
    }
    for _ in range(n_layers):
        params["blocks"].append({
            "ln1_g": jnp.ones((1, d_model), jnp.float32),
            "ln1_b": jnp.zeros((1, d_model), jnp.float32),
            "qkv_w": nrm(next(it), (d_model, 3 * d_model)),
            "qkv_b": jnp.zeros((1, 3 * d_model), jnp.float32),
            "proj_w": nrm(next(it), (d_model, d_model)),
            "proj_b": jnp.zeros((1, d_model), jnp.float32),
            "ln2_g": jnp.ones((1, d_model), jnp.float32),
            "ln2_b": jnp.zeros((1, d_model), jnp.float32),
            "fc1_w": nrm(next(it), (d_model, d_ff)),
            "fc1_b": jnp.zeros((1, d_ff), jnp.float32),
            "fc2_w": nrm(next(it), (d_ff, d_model)),
            "fc2_b": jnp.zeros((1, d_model), jnp.float32),
        })
    return params


def transformer_block(y, blk, n_heads):
    """Pre-norm ViT block, eval mode (dropout / drop_path = identity)."""
    b, S, D = y.shape
    y = attn_block(y, blk["ln1_g"], blk["ln1_b"], blk["qkv_w"], blk["qkv_b"],
                   blk["proj_w"], blk["proj_b"], n_heads=n_heads)
    y = mlp_residual(y.reshape(b * S, D), blk["ln2_g"], blk["ln2_b"],
                     blk["fc1_w"], blk["fc1_b"], blk["fc2_w"], blk["fc2_b"]
                     ).reshape(b, S, D)
    return y


def mask_transformer_saps_forward(params, x_list, im_size):
    """Mirrors MaskTransformer_SAPS.forward: x is a list of (b, N, d_encoder)."""
    del im_size  # unpacked but unused in the reference forward
    n_cls = params["n_cls"]
    n_heads = params["n_heads"]
    D = params["proj_dec_w"].shape[1]

    outs = []
    for xi in x_list:
        b, N, d_enc = xi.shape
        # proj_dec (row-tiled linear)
        y = linear(xi.reshape(b * N, d_enc), params["proj_dec_w"],
                   params["proj_dec_b"]).reshape(b, N, D)
        # append class embeddings
        cls = jnp.broadcast_to(params["cls_emb"], (b, n_cls, D))
        y = jnp.concatenate([y, cls], axis=1)                     # (b, S, D)

        for blk in params["blocks"]:
            y = transformer_block(y, blk, n_heads)

        # decoder LayerNorm is fused into the mask-head kernel (LN is row-wise
        # so it commutes with the patches/class split below).
        patches = y[:, :N]                                        # (b, N, D)
        cls_tok = y[:, N:]                                        # (b, n_cls, D)
        masks = mask_head(patches, cls_tok,
                          params["dec_norm_g"], params["dec_norm_b"],
                          params["proj_patch"], params["proj_classes"],
                          params["mask_norm_g"], params["mask_norm_b"])
        outs.append(masks)                                        # (b, N, n_cls)
    return outs


# ----------------------------------------------------------------------------
# Demo
# ----------------------------------------------------------------------------
if __name__ == "__main__":
    n_cls, d_encoder, n_layers, n_heads, d_model, d_ff = 4, 32, 2, 2, 32, 64
    drop_path_rate, dropout = 0.0, 0.0  # eval-mode identities

    key = jax.random.PRNGKey(0)
    pkey, k1, k2 = jax.random.split(key, 3)
    params = init_params(pkey, n_cls, d_encoder, n_layers, n_heads, d_model, d_ff)

    # list of B=2 feature maps, each (b=1, N=16 tokens, d_encoder)
    x_list = [jax.random.normal(k1, (1, 16, d_encoder), jnp.float32),
              jax.random.normal(k2, (1, 16, d_encoder), jnp.float32)]
    im_size = (4, 4)  # H * W == N

    out = mask_transformer_saps_forward(params, x_list, im_size)
    for o in out:
        jax.block_until_ready(o)
    assert out[0].shape == (1, 16, n_cls) and out[1].shape == (1, 16, n_cls)
    assert all(bool(jnp.all(jnp.isfinite(o))) for o in out)
    print("KERNEL_OK")
</pallas_src>

<mosaic_0001>
module attributes {stable_mosaic.version = 11 : i64} {
  func.func @_linear_kernel(%arg0: i32, %arg1: memref<16x32xf32, #tpu.memory_space<vmem>>, %arg2: memref<32x32xbf16, #tpu.memory_space<vmem>>, %arg3: memref<1x32xf32, #tpu.memory_space<vmem>>, %arg4: memref<16x32xf32, #tpu.memory_space<vmem>>) attributes {dimension_semantics = [#tpu.dimension_semantics<parallel>], iteration_bounds = array<i64: 1>, scalar_prefetch = 0 : i64, scratch_operands = 0 : i64, tpu.core_type = #tpu.core_type<tc>, window_params = [{transform_indices = @transform_0, window_bounds = array<i64: 16, 32>}, {pipeline_mode = #tpu.pipeline_mode<synchronous>, transform_indices = @transform_1, window_bounds = array<i64: 32, 32>}, {pipeline_mode = #tpu.pipeline_mode<synchronous>, transform_indices = @transform_2, window_bounds = array<i64: 1, 32>}, {transform_indices = @transform_3, window_bounds = array<i64: 16, 32>}]} {
    %c0 = arith.constant 0 : index
    %c0_0 = arith.constant 0 : index
    %0 = vector.load %arg1[%c0, %c0_0] : memref<16x32xf32, #tpu.memory_space<vmem>>, vector<16x32xf32>
    %1 = arith.truncf %0 : vector<16x32xf32> to vector<16x32xbf16>
    %c0_1 = arith.constant 0 : index
    %c0_2 = arith.constant 0 : index
    %2 = vector.load %arg2[%c0_1, %c0_2] : memref<32x32xbf16, #tpu.memory_space<vmem>>, vector<32x32xbf16>
    %cst = arith.constant dense<0.000000e+00> : vector<16x32xf32>
    %3 = tpu.matmul %1, %2, %cst {dimension_numbers = #tpu.dot_dimension_numbers<[1], [0], [0], [1], [0, 0, 1, 1], [], []>} : vector<16x32xbf16>, vector<32x32xbf16>, vector<16x32xf32> -> vector<16x32xf32>
    %c0_3 = arith.constant 0 : index
    %c0_4 = arith.constant 0 : index
    %4 = vector.load %arg3[%c0_3, %c0_4] : memref<1x32xf32, #tpu.memory_space<vmem>>, vector<1x32xf32>
    %5 = vector.broadcast %4 : vector<1x32xf32> to vector<16x32xf32>
    %6 = arith.addf %3, %5 : vector<16x32xf32>
    %c0_5 = arith.constant 0 : index
    %c0_6 = arith.constant 0 : index
    %7 = vector.load %arg4[%c0_5, %c0_6] : memref<16x32xf32, #tpu.memory_space<vmem>>, vector<16x32xf32>
    tpu.vector_store %arg4[%c0_5, %c0_6], %6 {strides = array<i32>} : memref<16x32xf32, #tpu.memory_space<vmem>>, vector<16x32xf32>,
    return
  }
  func.func @transform_0(%arg0: i32) -> (i32, i32) {
    %c0_i32 = arith.constant 0 : i32
    %c0_i32_0 = arith.constant 0 : i32
    return %arg0, %c0_i32 : i32, i32
  }
  func.func @transform_1(%arg0: i32) -> (i32, i32) {
    %c0_i32 = arith.constant 0 : i32
    %c0_i32_0 = arith.constant 0 : i32
    %c0_i32_1 = arith.constant 0 : i32
    return %c0_i32, %c0_i32_0 : i32, i32
  }
  func.func @transform_2(%arg0: i32) -> (i32, i32) {
    %c0_i32 = arith.constant 0 : i32
    %c0_i32_0 = arith.constant 0 : i32
    %c0_i32_1 = arith.constant 0 : i32
    return %c0_i32, %c0_i32_0 : i32, i32
  }
  func.func @transform_3(%arg0: i32) -> (i32, i32) {
    %c0_i32 = arith.constant 0 : i32
    %c0_i32_0 = arith.constant 0 : i32
    return %arg0, %c0_i32 : i32, i32
  }
}

</mosaic_0001>

<bundles_post_ra>
// kernel: tpu_custom_call.1
= control target key start
LH: loop header
LB: loop body
LE: loop exit
PB: predicated region body
PF: predicated region fallthrough
CT: control target
= control target key end

     0   :  { %8 = vsyncpa [#allocation3], 0  ;;  %s307_s0 = inlined_call_operand.hbm [shape: f32[16,32], index: 0, kind: input, shape index: {}]   ;;  %s308_s1 = inlined_call_operand.hbm [shape: bf16[32,32], index: 1, kind: input, shape index: {}]   ;;  %s309_s2 = inlined_call_operand.vmem [shape: f32[1,32], index: 2, kind: input, shape index: {}]   ;;  %s310_s3 = inlined_call_operand.hbm [shape: f32[16,32], index: 3, kind: output, shape index: {}]  }
   0x1   :  { %9 = vsyncpa [#allocation6], 0 }
   0x2   :  { %10 = vsyncpa [#allocation4], 0  ;;  %s233_s12 = smov [#allocation2]   ;;  %s161_s16 = scalar_lea.hbm %s307_s0, 256 }
   0x3   :  { %s16_s13 = sshll.u32 %s233_s12, 4  ;;  %p162_p0 = scmp.ne.s32.totalorder %s307_s0, %s161_s16  ;;  %s17_s13 = int_to_ptr.vmem [resolvable:$true] %s16_s13 }
   0x4   :  { %p165_p1 = scmp.lt.u32.totalorder %s161_s16, %s307_s0 }
   0x6   :  { %p167_p2 = pnand %p165_p1, %p162_p0 }
   0x8   :  { %170 = shalt.err (!%p167_p2)
}
   0x9   :  { %s171_s21 = scalar_lea.vmem %s17_s13, 256  ;;  %p176_p4 = scmp.lt.s32.totalorder %s17_s13, %s17_s13 }
   0xa   :  { %p172_p3 = scmp.ne.s32.totalorder %s17_s13, %s171_s21  ;;  %p177_p5 = scmp.lt.s32.totalorder %s171_s21, %s171_s21 }
   0xc   :  { %p178_p6 = por %p177_p5, %p176_p4 }
   0xe   :  { %p179_p7 = pnand %p178_p6, %p172_p3 }
  0x10   :  { %182 = shalt.err (!%p179_p7)
}
  0x11   :  { %s234_s22 = smov 128   ;;  %s235_s23 = smov 8  }
  0x12   :  { %22 = dma.hbm_to_vmem [thread:$0]  %s307_s0, 256, %s17_s13, [#allocation3], %s234_s22, %s234_s22, %s235_s23  }
  0x13   :  { %s236_s26 = smov [#allocation5]   ;;  %s183_s30 = scalar_lea.hbm %s308_s1, 256 }
  0x14   :  { %s28_s27 = sshll.u32 %s236_s26, 4  ;;  %p184_p8 = scmp.ne.s32.totalorder %s308_s1, %s183_s30  ;;  %s29_s27 = int_to_ptr.vmem [resolvable:$true] %s28_s27 }
  0x15   :  { %p187_p9 = scmp.lt.u32.totalorder %s183_s30, %s308_s1 }
  0x17   :  { %p189_p10 = pnand %p187_p9, %p184_p8 }
  0x19   :  { %192 = shalt.err (!%p189_p10)
}
  0x1a   :  { %s193_s8 = scalar_lea.vmem %s29_s27, 256  ;;  %p198_p12 = scmp.lt.s32.totalorder %s29_s27, %s29_s27 }
  0x1b   :  { %p194_p11 = scmp.ne.s32.totalorder %s29_s27, %s193_s8  ;;  %p199_p13 = scmp.lt.s32.totalorder %s193_s8, %s193_s8 }
  0x1d   :  { %p200_p0 = por %p199_p13, %p198_p12 }
  0x1f   :  { %p201_p1 = pnand %p200_p0, %p194_p11 }
  0x21   :  { %204 = shalt.err (!%p201_p1)
}
  0x22   :  { %s237_s0 = smov 64   ;;  %s238_s9 = smov 4  }
  0x23   :  { %34 = dma.hbm_to_vmem [thread:$0]  %s308_s1, 256, %s29_s27, [#allocation6], %s237_s0, %s237_s0, %s238_s9  }
  0x24   :  { %227 = dma.done.wait [#allocation3], 256  }
  0x25   :  { %228 = vsyncadd [#allocation3], 4294967040 }
  0x26   :  { %229 = dma.done.wait [#allocation6], 256  }
  0x27   :  { %230 = vsyncadd [#allocation6], 4294967040  ;;  %v239_v0 = vmov 0.0   ;;  %vm240_vm0 = vmmov 0   ;;  %v159_v1 = vld [vmem:[#allocation5] sm:$0xff]   ;;  %v160_v2 = vld [vmem:[#allocation5 + $0x8] sm:$0xff]  }
  0x28   :  { %142 = vmatprep.subr.bf16.mxu0 %v239_v0  ;;  %146 = vmatprep.mubr.msk.bf16.mxu0 %vm240_vm0, %v239_v0  ;;  %v44_v3 = vld [vmem:[#allocation2] sm:$0xff]  ;;  %v45_v4 = vld [vmem:[#allocation2 + $0x8] sm:$0xff]  ;;  %vm70_vm1 = vcmask 261120   ;;  %s241_s13 = smov [#allocation7]  }
  0x29   :  { %143 = vmatpush3.bf16.msra.mxu0 %v159_v1  ;;  %v46_v5 = vpack.c.bf16 %v45_v4, %v44_v3  ;;  %v135_v6 = vld [vmem:[%s309_s2] ss:$0 sm:$0xff]  ;;  %s122_s14 = sshll.u32 %s241_s13, 4  ;;  %s123_s14 = int_to_ptr.vmem [resolvable:$true] %s122_s14 }
  0x2a   :  { %144 = vmatprep.subr.bf16.mxu0 %v239_v0  ;;  %s205_s15 = scalar_lea.vmem %s123_s14, 256  ;;  %p210_p3 = scmp.lt.s32.totalorder %s123_s14, %s123_s14 }
  0x2b   :  { %p206_p2 = scmp.ne.s32.totalorder %s123_s14, %s205_s15  ;;  %p211_p4 = scmp.lt.s32.totalorder %s205_s15, %s205_s15 }
  0x2d   :  { %145 = vmatpush3.bf16.msra.mxu0 %v160_v2  ;;  %p212_p5 = por %p211_p4, %p210_p3 }
  0x2f   :  { %p213_p6 = pnand %p212_p5, %p206_p2 }
  0x30   :  { %147 = vmatmul.mubr.msk.bf16.vlgmr.msra.gmra.mrb[0].mxu0 %vm70_vm1, %v46_v5 }
 0x103   :  { %v108_v7 = vpop.f32.mrb[0].mxu0 }
 0x104   :  { %v109_v8 = vadd.f32 %v135_v6, %v108_v7  ;;  %v148_v9 = vpop.f32.mrb[1].mxu0 }
 0x105   :  { %v111_v10 = vpop.f32.mrb[2].mxu0 }
 0x106   :  { %115 = vst.msk [vmem:[#allocation7] sm:$0xff] %vm70_vm1, %v109_v8  ;;  %v112_v11 = vadd.f32 %v135_v6, %v111_v10  ;;  %v149_v12 = vpop.f32.mrb[3].mxu0 }
 0x108   :  { %116 = vst.msk [vmem:[#allocation7 + $0x8] sm:$0xff] %vm70_vm1, %v112_v11 }
 0x109   :  { %216 = shalt.err (!%p213_p6)
}
 0x10a   :  { %s217_s17 = scalar_lea.hbm %s310_s3, 256 }
 0x10b   :  { %p218_p7 = scmp.ne.s32.totalorder %s310_s3, %s217_s17  ;;  %p221_p8 = scmp.lt.u32.totalorder %s217_s17, %s310_s3 }
 0x10d   :  { %p223_p9 = pnand %p221_p8, %p218_p7 }
 0x10f   :  { %226 = shalt.err (!%p223_p9)
}
 0x110   :  { %128 = dma.vmem_to_hbm [thread:$0]  %s123_s14, 256, %s310_s3, [#allocation4], %s234_s22, %s234_s22, %s235_s23  }
 0x111   :  { %231 = dma.done.wait [#allocation4], 256  }
 0x112   :  { %232 = vsyncadd [#allocation4], 4294967040 }
 0x113   :  { %132 = vsyncpa [#allocation3], 1 }
 0x114   :  { %133 = vsyncpa [#allocation6], 1 }
 0x115   :  { %134 = vsyncpa [#allocation4], 1 }

</bundles_post_ra>
